<compile_context>
chip_gen: v5e
topology: v5e:2x2
jax: 0.10.0
libtpu: 0.0.40
codegen_flags: <defaults>
</compile_context>

<pallas_src>
import jax
import jax.numpy as jnp
from jax.experimental import pallas as pl
from jax.experimental.pallas import tpu as pltpu


# ----------------------- node-side kernel (runs once) -----------------------
def node_kernel(xT_ref, sw1T_ref, sb1_ref, sw2T_ref, sb2_ref, ew1srT_ref, sr_ref):
    """emb^T = W2^T relu(W1^T x^T + b1) + b2 ; sr = [W1s^T emb^T | W1r^T emb^T]."""
    f32 = jnp.float32
    cdt = sw1T_ref.dtype                       # MXU-operand dtype (bf16 or f32)
    h_dim = sw2T_ref.shape[0]
    n_pad = xT_ref.shape[1]

    h = jnp.dot(sw1T_ref[...], xT_ref[...], preferred_element_type=f32) + sb1_ref[...]
    h = jnp.maximum(h, 0.0).astype(cdt)                                      # [H, Np]
    emb = (jnp.dot(sw2T_ref[...], h, preferred_element_type=f32)
           + sb2_ref[...]).astype(cdt)                                       # [H, Np]

    # Stacked edge-first-layer projection: one [2H, H] x [H, Np] MXU op instead of two.
    sr = jnp.dot(ew1srT_ref[...], emb, preferred_element_type=f32)           # [2H, Np]
    # Lane-concatenated layout: sender half | receiver half  (Np is 128-aligned).
    sr_ref[:, :n_pad] = sr[:h_dim].astype(sr_ref.dtype)
    sr_ref[:, n_pad:] = sr[h_dim:].astype(sr_ref.dtype)


# --------------------------- per-edge-tile kernel ---------------------------
def edge_kernel(send_ref, recv_ref, sr_ref, eb1_ref, ew2T_ref, eb2_ref, o_ref):
    f32 = jnp.float32
    cdt = sr_ref.dtype
    two_n = sr_ref.shape[1]                    # 2 * N_pad

    # Combined sender/receiver one-hot from a [2Np, 1] sublane iota broadcast
    # against the id rows.  recv ids already carry the +N_pad offset, so the two
    # matches are disjoint and OR == add; 0/1 are exact in bf16.
    iota_col = jax.lax.broadcasted_iota(jnp.int32, (two_n, 1), 0)
    onehot = ((iota_col == send_ref[...])
              | (iota_col == recv_ref[...])).astype(cdt)                     # [2Np, tile_e]

    # One MXU contraction yields s_gathered + r_gathered directly.
    gathered = jnp.dot(sr_ref[...], onehot, preferred_element_type=f32)      # [H, tile_e]
    act = jnp.maximum(gathered + eb1_ref[...], 0.0).astype(cdt)
    scores = jnp.dot(ew2T_ref[...], act, preferred_element_type=f32) + eb2_ref[0]
    o_ref[...] = scores.astype(o_ref.dtype)                                  # [1, tile_e]


# ------------------------------- model wrapper ------------------------------
def _pick_tile_e(E, n_pad, cdt_bytes, tile_e_req):
    # Keep the dominant [2*N_pad, tile_e] one-hot under ~4 MiB (v7x-safe; v5e/v6e
    # have plenty of headroom and get the full requested tile).
    onehot_budget = 4 * 1024 * 1024
    max_t = max(128, onehot_budget // max(2 * n_pad * cdt_bytes, 1))
    t = min(int(tile_e_req), int(max_t))
    t = max(128, (t // 128) * 128)
    t = min(t, 128 * pl.cdiv(E, 128))          # no bigger than padded E
    return t


def set2graph_forward(params, x, edge_index, *,
                      compute_dtype=jnp.bfloat16, tile_e=1024):
    """Set2GraphModel forward.  compute_dtype controls MXU-operand precision
    (bf16 works on v5e/v6e/v7x; biases/ReLU/accumulation stay f32).  Use
    jnp.float32 for exact agreement with the f32 reference."""
    N, in_dim = x.shape
    H = params["s_w2"].shape[1]
    OUT = params["e_w2"].shape[1]
    assert OUT == 1, "lane-dense output path assumes output_dim == 1"

    E = int(edge_index.shape[1])
    if E == 0:                                  # guard: grid=(0,) leaves output unwritten
        return jnp.zeros((0,), jnp.float32)

    cdt = compute_dtype
    cdt_bytes = jnp.dtype(cdt).itemsize

    # Pad node count to a lane-aligned multiple of 128; padded columns are never
    # selected by the gather.
    n_pad = 128 * pl.cdiv(N, 128)
    xT = jnp.zeros((in_dim, n_pad), cdt).at[:, :N].set(x.T.astype(cdt))

    # Pad edges; receiver ids carry the +n_pad offset into the combined sr slab.
    tile_e = _pick_tile_e(E, n_pad, cdt_bytes, tile_e)
    e_pad = tile_e * pl.cdiv(E, tile_e)
    send = jnp.zeros((1, e_pad), jnp.int32).at[0, :E].set(
        edge_index[0].astype(jnp.int32))
    recv = jnp.full((1, e_pad), n_pad, jnp.int32).at[0, :E].set(
        edge_index[1].astype(jnp.int32) + n_pad)

    # Weight prep (transposed, MXU-operand dtype); biases stay f32.
    sw1T = params["s_w1"].T.astype(cdt)                                      # [H, IN]
    sw2T = params["s_w2"].T.astype(cdt)                                      # [H, H]
    ew1srT = jnp.concatenate([params["e_w1"][:H].T,                          # sender rows
                              params["e_w1"][H:].T], axis=0).astype(cdt)     # [2H, H]
    ew2T = params["e_w2"].T.astype(cdt)                                      # [1, H]
    sb1 = params["s_b1"].T                                                   # [H, 1]
    sb2 = params["s_b2"].T                                                   # [H, 1]
    eb1 = params["e_b1"].T                                                   # [H, 1]
    eb2 = params["e_b2"].reshape(OUT)                                        # [1] (SMEM)

    full = lambda i: (0, 0)

    # ---- node kernel: one shot, produces [H, 2*N_pad] sender|receiver slab ----
    sr = pl.pallas_call(
        node_kernel,
        out_shape=jax.ShapeDtypeStruct((H, 2 * n_pad), cdt),
        grid=(1,),
        in_specs=[
            pl.BlockSpec(xT.shape, full),
            pl.BlockSpec(sw1T.shape, full),
            pl.BlockSpec(sb1.shape, full),
            pl.BlockSpec(sw2T.shape, full),
            pl.BlockSpec(sb2.shape, full),
            pl.BlockSpec(ew1srT.shape, full),
        ],
        out_specs=pl.BlockSpec((H, 2 * n_pad), full),
    )(xT, sw1T, sb1, sw2T, sb2, ew1srT)

    # ---- edge kernel: per-tile gather + ReLU + H->1 matvec, lane-dense output ----
    scores = pl.pallas_call(
        edge_kernel,
        out_shape=jax.ShapeDtypeStruct((1, e_pad), jnp.float32),
        grid=(e_pad // tile_e,),
        in_specs=[
            pl.BlockSpec((1, tile_e), lambda i: (0, i)),     # sender ids
            pl.BlockSpec((1, tile_e), lambda i: (0, i)),     # receiver ids (+n_pad)
            # Grid-invariant operands (for very large H/N: pipeline_mode=pl.Buffered(1)).
            pl.BlockSpec(sr.shape, full),
            pl.BlockSpec(eb1.shape, full),
            pl.BlockSpec(ew2T.shape, full),
            pl.BlockSpec(memory_space=pltpu.SMEM),           # scalar output bias
        ],
        out_specs=pl.BlockSpec((1, tile_e), lambda i: (0, i)),
        compiler_params=pltpu.CompilerParams(
            dimension_semantics=("parallel",)),              # edge axis shards across TCs on v7x
    )(send, recv, sr, eb1, ew2T, eb2)

    return scores[0, :E]                                     # matches .squeeze(-1)


# ------------------------------ params / reference ------------------------------
def init_params(key, input_dim, hidden_dim, output_dim):
    ks = jax.random.split(key, 8)

    def lin(kw, kb, fan_in, fan_out):
        bound = 1.0 / jnp.sqrt(fan_in)
        w = jax.random.uniform(kw, (fan_in, fan_out), jnp.float32, -bound, bound)
        b = jax.random.uniform(kb, (1, fan_out), jnp.float32, -bound, bound)
        return w, b

    s_w1, s_b1 = lin(ks[0], ks[1], input_dim, hidden_dim)        # Linear(in, H)
    s_w2, s_b2 = lin(ks[2], ks[3], hidden_dim, hidden_dim)       # Linear(H, H)
    e_w1, e_b1 = lin(ks[4], ks[5], 2 * hidden_dim, hidden_dim)   # Linear(2H, H)
    e_w2, e_b2 = lin(ks[6], ks[7], hidden_dim, output_dim)       # Linear(H, out)
    return dict(s_w1=s_w1, s_b1=s_b1, s_w2=s_w2, s_b2=s_b2,
                e_w1=e_w1, e_b1=e_b1, e_w2=e_w2, e_b2=e_b2)


def reference_forward(params, x, edge_index):
    emb = jnp.maximum(x @ params["s_w1"] + params["s_b1"], 0.0) @ params["s_w2"] + params["s_b2"]
    s = emb[edge_index[0]]
    r = emb[edge_index[1]]
    ef = jnp.concatenate([s, r], axis=-1)
    h = jnp.maximum(ef @ params["e_w1"] + params["e_b1"], 0.0)
    return jnp.squeeze(h @ params["e_w2"] + params["e_b2"], axis=-1)


if __name__ == "__main__":
    input_dim, hidden_dim, output_dim = 16, 32, 1
    num_tracks = 8

    key = jax.random.PRNGKey(0)
    kx, kp = jax.random.split(key)
    x = jax.random.normal(kx, (num_tracks, input_dim), jnp.float32)

    # fully-connected edge set: E = N*N = 64 edges
    s_idx, r_idx = jnp.meshgrid(jnp.arange(num_tracks), jnp.arange(num_tracks),
                                indexing="ij")
    edge_index = jnp.stack([s_idx.reshape(-1), r_idx.reshape(-1)], axis=0).astype(jnp.int32)

    params = init_params(kp, input_dim, hidden_dim, output_dim)
    ref = reference_forward(params, x, edge_index)

    # exact f32 path
    out_f32 = jax.block_until_ready(
        set2graph_forward(params, x, edge_index, compute_dtype=jnp.float32))
    assert out_f32.shape == (edge_index.shape[1],)
    assert jnp.allclose(out_f32, ref, atol=1e-5, rtol=1e-4)

    # default path: bf16 MXU operands (v5e / v6e / v7x), f32 bias/ReLU/accumulate
    out_def = jax.block_until_ready(set2graph_forward(params, x, edge_index))
    assert out_def.shape == (edge_index.shape[1],)
    assert jnp.allclose(out_def, ref, atol=5e-2, rtol=5e-2)

    print("KERNEL_OK")
</pallas_src>

<mosaic_0001>
module attributes {stable_mosaic.version = 11 : i64} {
  func.func @node_kernel(%arg0: i32, %arg1: memref<16x128xf32, #tpu.memory_space<vmem>>, %arg2: memref<32x16xf32, #tpu.memory_space<vmem>>, %arg3: memref<32x1xf32, #tpu.memory_space<vmem>>, %arg4: memref<32x32xf32, #tpu.memory_space<vmem>>, %arg5: memref<32x1xf32, #tpu.memory_space<vmem>>, %arg6: memref<64x32xf32, #tpu.memory_space<vmem>>, %arg7: memref<32x256xf32, #tpu.memory_space<vmem>>) attributes {dimension_semantics = [#tpu.dimension_semantics<arbitrary>], iteration_bounds = array<i64: 1>, scalar_prefetch = 0 : i64, scratch_operands = 0 : i64, tpu.core_type = #tpu.core_type<tc>, window_params = [{pipeline_mode = #tpu.pipeline_mode<synchronous>, transform_indices = @transform_0, window_bounds = array<i64: 16, 128>}, {pipeline_mode = #tpu.pipeline_mode<synchronous>, transform_indices = @transform_1, window_bounds = array<i64: 32, 16>}, {pipeline_mode = #tpu.pipeline_mode<synchronous>, transform_indices = @transform_2, window_bounds = array<i64: 32, 1>}, {pipeline_mode = #tpu.pipeline_mode<synchronous>, transform_indices = @transform_3, window_bounds = array<i64: 32, 32>}, {pipeline_mode = #tpu.pipeline_mode<synchronous>, transform_indices = @transform_4, window_bounds = array<i64: 32, 1>}, {pipeline_mode = #tpu.pipeline_mode<synchronous>, transform_indices = @transform_5, window_bounds = array<i64: 64, 32>}, {pipeline_mode = #tpu.pipeline_mode<synchronous>, transform_indices = @transform_6, window_bounds = array<i64: 32, 256>}]} {
    %c0 = arith.constant 0 : index
    %c0_0 = arith.constant 0 : index
    %0 = vector.load %arg2[%c0, %c0_0] : memref<32x16xf32, #tpu.memory_space<vmem>>, vector<32x16xf32>
    %c0_1 = arith.constant 0 : index
    %c0_2 = arith.constant 0 : index
    %1 = vector.load %arg1[%c0_1, %c0_2] : memref<16x128xf32, #tpu.memory_space<vmem>>, vector<16x128xf32>
    %cst = arith.constant dense<0.000000e+00> : vector<32x128xf32>
    %2 = tpu.matmul %0, %1, %cst {dimension_numbers = #tpu.dot_dimension_numbers<[1], [0], [0], [1], [0, 0, 1, 1], [], []>} : vector<32x16xf32>, vector<16x128xf32>, vector<32x128xf32> -> vector<32x128xf32>
    %c0_3 = arith.constant 0 : index
    %c0_4 = arith.constant 0 : index
    %3 = vector.load %arg3[%c0_3, %c0_4] : memref<32x1xf32, #tpu.memory_space<vmem>>, vector<32x1xf32>
    %4 = vector.broadcast %3 : vector<32x1xf32> to vector<32x128xf32>
    %5 = arith.addf %2, %4 : vector<32x128xf32>
    %cst_5 = arith.constant 0.000000e+00 : f32
    %6 = vector.broadcast %cst_5 : f32 to vector<32x128xf32>
    %7 = arith.maximumf %5, %6 : vector<32x128xf32>
    %c0_6 = arith.constant 0 : index
    %c0_7 = arith.constant 0 : index
    %8 = vector.load %arg4[%c0_6, %c0_7] : memref<32x32xf32, #tpu.memory_space<vmem>>, vector<32x32xf32>
    %cst_8 = arith.constant dense<0.000000e+00> : vector<32x128xf32>
    %9 = tpu.matmul %8, %7, %cst_8 {dimension_numbers = #tpu.dot_dimension_numbers<[1], [0], [0], [1], [0, 0, 1, 1], [], []>} : vector<32x32xf32>, vector<32x128xf32>, vector<32x128xf32> -> vector<32x128xf32>
    %c0_9 = arith.constant 0 : index
    %c0_10 = arith.constant 0 : index
    %10 = vector.load %arg5[%c0_9, %c0_10] : memref<32x1xf32, #tpu.memory_space<vmem>>, vector<32x1xf32>
    %11 = vector.broadcast %10 : vector<32x1xf32> to vector<32x128xf32>
    %12 = arith.addf %9, %11 : vector<32x128xf32>
    %c0_11 = arith.constant 0 : index
    %c0_12 = arith.constant 0 : index
    %13 = vector.load %arg6[%c0_11, %c0_12] : memref<64x32xf32, #tpu.memory_space<vmem>>, vector<64x32xf32>
    %cst_13 = arith.constant dense<0.000000e+00> : vector<64x128xf32>
    %14 = tpu.matmul %13, %12, %cst_13 {dimension_numbers = #tpu.dot_dimension_numbers<[1], [0], [0], [1], [0, 0, 1, 1], [], []>} : vector<64x32xf32>, vector<32x128xf32>, vector<64x128xf32> -> vector<64x128xf32>
    %15 = vector.extract_strided_slice %14 {offsets = [0, 0], sizes = [32, 128], strides = [1, 1]} : vector<64x128xf32> to vector<32x128xf32>
    %c0_14 = arith.constant 0 : index
    %c0_15 = arith.constant 0 : index
    %16 = vector.load %arg7[%c0_14, %c0_15] : memref<32x256xf32, #tpu.memory_space<vmem>>, vector<32x128xf32>
    tpu.vector_store %arg7[%c0_14, %c0_15], %15 {strides = array<i32>} : memref<32x256xf32, #tpu.memory_space<vmem>>, vector<32x128xf32>,
    %17 = vector.extract_strided_slice %14 {offsets = [32, 0], sizes = [32, 128], strides = [1, 1]} : vector<64x128xf32> to vector<32x128xf32>
    %c0_16 = arith.constant 0 : index
    %c128 = arith.constant 128 : index
    %18 = vector.load %arg7[%c0_16, %c128] : memref<32x256xf32, #tpu.memory_space<vmem>>, vector<32x128xf32>
    tpu.vector_store %arg7[%c0_16, %c128], %17 {strides = array<i32>} : memref<32x256xf32, #tpu.memory_space<vmem>>, vector<32x128xf32>,
    return
  }
  func.func @transform_0(%arg0: i32) -> (i32, i32) {
    %c0_i32 = arith.constant 0 : i32
    %c0_i32_0 = arith.constant 0 : i32
    %c0_i32_1 = arith.constant 0 : i32
    return %c0_i32, %c0_i32_0 : i32, i32
  }
  func.func @transform_1(%arg0: i32) -> (i32, i32) {
    %c0_i32 = arith.constant 0 : i32
    %c0_i32_0 = arith.constant 0 : i32
    %c0_i32_1 = arith.constant 0 : i32
    return %c0_i32, %c0_i32_0 : i32, i32
  }
  func.func @transform_2(%arg0: i32) -> (i32, i32) {
    %c0_i32 = arith.constant 0 : i32
    %c0_i32_0 = arith.constant 0 : i32
    %c0_i32_1 = arith.constant 0 : i32
    return %c0_i32, %c0_i32_0 : i32, i32
  }
  func.func @transform_3(%arg0: i32) -> (i32, i32) {
    %c0_i32 = arith.constant 0 : i32
    %c0_i32_0 = arith.constant 0 : i32
    %c0_i32_1 = arith.constant 0 : i32
    return %c0_i32, %c0_i32_0 : i32, i32
  }
  func.func @transform_4(%arg0: i32) -> (i32, i32) {
    %c0_i32 = arith.constant 0 : i32
    %c0_i32_0 = arith.constant 0 : i32
    %c0_i32_1 = arith.constant 0 : i32
    return %c0_i32, %c0_i32_0 : i32, i32
  }
  func.func @transform_5(%arg0: i32) -> (i32, i32) {
    %c0_i32 = arith.constant 0 : i32
    %c0_i32_0 = arith.constant 0 : i32
    %c0_i32_1 = arith.constant 0 : i32
    return %c0_i32, %c0_i32_0 : i32, i32
  }
  func.func @transform_6(%arg0: i32) -> (i32, i32) {
    %c0_i32 = arith.constant 0 : i32
    %c0_i32_0 = arith.constant 0 : i32
    %c0_i32_1 = arith.constant 0 : i32
    return %c0_i32, %c0_i32_0 : i32, i32
  }
}

</mosaic_0001>

<bundles_post_ra>
// kernel: tpu_custom_call.1
= control target key start
LH: loop header
LB: loop body
LE: loop exit
PB: predicated region body
PF: predicated region fallthrough
CT: control target
= control target key end

     0   :  { %vm54_vm0 = vcmask 130048   ;;  %v322_v3 = vmov 0   ;;  %s458_s0 = inlined_call_operand.vmem [shape: f32[16,128], index: 0, kind: input, shape index: {}]   ;;  %s459_s1 = inlined_call_operand.vmem [shape: f32[32,16], index: 1, kind: input, shape index: {}]   ;;  %s460_s2 = inlined_call_operand.vmem [shape: f32[32,1], index: 2, kind: input, shape index: {}]   ;;  %s461_s3 = inlined_call_operand.vmem [shape: f32[32,32], index: 3, kind: input, shape index: {}]   ;;  %s462_s4 = inlined_call_operand.vmem [shape: f32[32,1], index: 4, kind: input, shape index: {}]   ;;  %s463_s5 = inlined_call_operand.vmem [shape: f32[64,32], index: 5, kind: input, shape index: {}]   ;;  %s464_s6 = inlined_call_operand.hbm [shape: f32[32,256], index: 6, kind: output, shape index: {}]  }
   0x1   :  { %v29_v0 = vld [vmem:[%s458_s0 + $0x8] sm:$0xff]  ;;  %v28_v1 = vld [vmem:[%s458_s0] sm:$0xff]  ;;  %294 = vset.pattern.permute.xlu1 %v322_v3  ;;  %293 = vset.pattern.permute.xlu0 %v322_v3  ;;  %v33_v5 = vld [vmem:[%s460_s2 + $0x18] sm:$0xff] }
   0x2   :  { %81 = vmatpush.msra.mxu0 %v29_v0  ;;  %v24_v2 = vld [vmem:[%s459_s1] sm:$0xff]  ;;  %v31_v4 = vld [vmem:[%s460_s2 + $0x8] sm:$0xff]  ;;  %51 = vperm.xlu0 %293, %v33_v5  }
   0x3   :  { %41 = vperm.xlu1 %294, %v31_v4   ;;  %295 = vset.pattern.permute.xlu2 %v322_v3 }
   0x4   :  { %82 = vmatpush.msra.mxu0 %v28_v1 }
   0x5   :  { %269 = vmatmul.msk.f32.vlgmr.msra.gmra.mxu0 %vm54_vm0, %v24_v2 }
   0x6   :  { %11 = vsyncpa [#allocation3], 0  ;;  %v30_v6 = vld [vmem:[%s460_s2] sm:$0xff]  ;;  %v32_v7 = vld [vmem:[%s460_s2 + $0x10] sm:$0xff]  ;;  %vm128_vm1 = vcmask 261120   ;;  %s323_s18 = smov [#allocation2]  }
   0x7   :  { %v25_v8 = vld [vmem:[%s459_s1 + $0x8] sm:$0xff]  ;;  %v104_v9 = vld [vmem:[%s462_s4] sm:$0xff]  ;;  %v26_v11 = vld [vmem:[%s459_s1 + $0x10] sm:$0xff]  ;;  %s255_s19 = sshll.u32 %s323_s18, 4  ;;  %s324_s21 = smov 256   ;;  %s256_s19 = int_to_ptr.vmem [resolvable:$true] %s255_s19 }
   0x8   :  { %v105_v10 = vld [vmem:[%s462_s4 + $0x8] sm:$0xff]  ;;  %v27_v12 = vld [vmem:[%s459_s1 + $0x18] sm:$0xff]  ;;  %v100_v30 = vld [vmem:[%s461_s3] sm:$0xff]  ;;  %s257_s1 = sshll.u32 %s464_s6, 4  ;;  %s325_s22 = smov 16   ;;  %s258_s1 = int_to_ptr.hbm [resolvable:$true] %s257_s1 }
   0x9   :  { %v107_v25 = vld [vmem:[%s462_s4 + $0x18] sm:$0xff]  ;;  %v106_v31 = vld [vmem:[%s462_s4 + $0x10] sm:$0xff]  ;;  %v101_v32 = vld [vmem:[%s461_s3 + $0x8] sm:$0xff] }
   0xa   :  { %46 = vperm.xlu0 %293, %v32_v7   ;;  %125 = vperm.xlu2 %295, %v107_v25   ;;  %v102_v33 = vld [vmem:[%s461_s3 + $0x10] sm:$0xff]  ;;  %v103_v34 = vld [vmem:[%s461_s3 + $0x18] sm:$0xff]  ;;  %v170_v47 = vld [vmem:[%s463_s5] sm:$0xff] }
   0xb   :  { %36 = vperm.xlu1 %294, %v30_v6   ;;  %v174_v48 = vld [vmem:[%s463_s5 + $0x20] sm:$0xff]  ;;  %v171_v49 = vld [vmem:[%s463_s5 + $0x8] sm:$0xff]  ;;  %v172_v51 = vld [vmem:[%s463_s5 + $0x10] sm:$0xff] }
   0xc   :  { %v175_v50 = vld [vmem:[%s463_s5 + $0x28] sm:$0xff]  ;;  %v176_v52 = vld [vmem:[%s463_s5 + $0x30] sm:$0xff]  ;;  %v173_v53 = vld [vmem:[%s463_s5 + $0x18] sm:$0xff] }
   0xd   :  { %270 = vmatmul.msk.f32.gmra.mxu0 %vm54_vm0, %v25_v8  ;;  %v177_v54 = vld [vmem:[%s463_s5 + $0x38] sm:$0xff] }
  0x12   :  { %115 = vperm.xlu0 %293, %v105_v10   ;;  %120 = vperm.xlu2 %295, %v106_v31  }
  0x13   :  { %110 = vperm.xlu1 %294, %v104_v9  }
  0x15   :  { %271 = vmatmul.msk.f32.gmra.mxu0 %vm54_vm0, %v26_v11 }
  0x1d   :  { %272 = vmatmul.msk.f32.gmra.mxu0 %vm54_vm0, %v27_v12 }
  0x64   :  { %v126_v37 = vpop.permute.xlu2 %125 }
  0x6c   :  { %v121_v39 = vpop.permute.xlu2 %120 }
  0x74   :  { %v52_v15 = vpop.permute.xlu0 %51 }
  0x75   :  { %v42_v16 = vpop.permute.xlu1 %41 }
  0x7c   :  { %v47_v18 = vpop.permute.xlu0 %46 }
  0x7d   :  { %v37_v22 = vpop.permute.xlu1 %36 }
  0x82   :  { %v84_v13 = vpop.f32.mrf.mxu0 }
  0x83   :  { %v85_v26 = vadd.f32 %v84_v13, %v37_v22 }
  0x84   :  { %v116_v43 = vpop.permute.xlu0 %115 }
  0x85   :  { %v96_v29 = vmax.f32 %v85_v26, 0.0  ;;  %v111_v45 = vpop.permute.xlu1 %110 }
  0x8a   :  { %v87_v14 = vpop.f32.mrf.mxu0 }
  0x8b   :  { %v88_v23 = vadd.f32 %v87_v14, %v42_v16 }
  0x8d   :  { %v97_v28 = vmax.f32 %v88_v23, 0.0 }
  0x92   :  { %v90_v17 = vpop.f32.mrf.mxu0 }
  0x93   :  { %v91_v20 = vadd.f32 %v90_v17, %v47_v18 }
  0x95   :  { %v98_v27 = vmax.f32 %v91_v20, 0.0 }
  0x9a   :  { %v93_v19 = vpop.f32.mrf.mxu0 }
  0x9b   :  { %v94_v21 = vadd.f32 %v93_v19, %v52_v15 }
  0x9d   :  { %v99_v24 = vmax.f32 %v94_v21, 0.0 }
  0x9f   :  { %153 = vmatpush.msra.mxu1 %v99_v24 }
  0xa1   :  { %154 = vmatpush.msra.mxu1 %v98_v27 }
  0xa3   :  { %155 = vmatpush.msra.mxu1 %v97_v28 }
  0xa5   :  { %156 = vmatpush.msra.mxu1 %v96_v29 }
  0xa6   :  { %273 = vmatmul.msk.f32.vlgmr.msra.gmra.mxu1 %vm128_vm1, %v100_v30 }
  0xae   :  { %274 = vmatmul.msk.f32.gmra.mxu1 %vm128_vm1, %v101_v32 }
  0xb6   :  { %275 = vmatmul.msk.f32.gmra.mxu1 %vm128_vm1, %v102_v33 }
  0xbe   :  { %276 = vmatmul.msk.f32.gmra.mxu1 %vm128_vm1, %v103_v34 }
 0x123   :  { %v158_v35 = vpop.f32.mrf.mxu1 }
 0x124   :  { %v159_v46 = vadd.f32 %v158_v35, %v111_v45 }
 0x12b   :  { %v161_v36 = vpop.f32.mrf.mxu1 }
 0x12c   :  { %v162_v44 = vadd.f32 %v161_v36, %v116_v43 }
 0x133   :  { %v164_v38 = vpop.f32.mrf.mxu1 }
 0x134   :  { %v165_v42 = vadd.f32 %v164_v38, %v121_v39 }
 0x13b   :  { %v167_v40 = vpop.f32.mrf.mxu1 }
 0x13c   :  { %v168_v41 = vadd.f32 %v167_v40, %v126_v37 }
 0x13e   :  { %214 = vmatpush.msra.mxu2 %v168_v41  ;;  %285 = vmatpush.msra.mxu3 %v168_v41 }
 0x140   :  { %215 = vmatpush.msra.mxu2 %v165_v42  ;;  %286 = vmatpush.msra.mxu3 %v165_v42 }
 0x142   :  { %216 = vmatpush.msra.mxu2 %v162_v44  ;;  %287 = vmatpush.msra.mxu3 %v162_v44 }
 0x144   :  { %217 = vmatpush.msra.mxu2 %v159_v46  ;;  %288 = vmatpush.msra.mxu3 %v159_v46 }
 0x145   :  { %277 = vmatmul.msk.f32.vlgmr.msra.gmra.mxu2 %vm128_vm1, %v170_v47  ;;  %281 = vmatmul.msk.f32.vlgmr.msra.gmra.mxu3 %vm128_vm1, %v174_v48 }
 0x14d   :  { %278 = vmatmul.msk.f32.gmra.mxu2 %vm128_vm1, %v171_v49  ;;  %282 = vmatmul.msk.f32.gmra.mxu3 %vm128_vm1, %v175_v50 }
 0x155   :  { %279 = vmatmul.msk.f32.gmra.mxu2 %vm128_vm1, %v172_v51  ;;  %283 = vmatmul.msk.f32.gmra.mxu3 %vm128_vm1, %v176_v52 }
 0x15d   :  { %280 = vmatmul.msk.f32.gmra.mxu2 %vm128_vm1, %v173_v53  ;;  %284 = vmatmul.msk.f32.gmra.mxu3 %vm128_vm1, %v177_v54 }
 0x1c8   :  { %v219_v55 = vpop.f32.mrf.mxu2  ;;  %v231_v56 = vpop.f32.mrf.mxu3 }
 0x1c9   :  { %243 = vst [vmem:[#allocation2] sm:$0xff] %v219_v55 }
 0x1ca   :  { %247 = vst [vmem:[#allocation2 + $0x8] sm:$0xff] %v231_v56 }
 0x1d0   :  { %v222_v57 = vpop.f32.mrf.mxu2  ;;  %v234_v58 = vpop.f32.mrf.mxu3 }
 0x1d1   :  { %244 = vst [vmem:[#allocation2 + $0x10] sm:$0xff] %v222_v57 }
 0x1d2   :  { %248 = vst [vmem:[#allocation2 + $0x18] sm:$0xff] %v234_v58 }
 0x1d8   :  { %v225_v59 = vpop.f32.mrf.mxu2  ;;  %v237_v60 = vpop.f32.mrf.mxu3 }
 0x1d9   :  { %245 = vst [vmem:[#allocation2 + $0x20] sm:$0xff] %v225_v59 }
 0x1da   :  { %249 = vst [vmem:[#allocation2 + $0x28] sm:$0xff] %v237_v60 }
 0x1e0   :  { %v228_v61 = vpop.f32.mrf.mxu2  ;;  %v240_v62 = vpop.f32.mrf.mxu3 }
 0x1e1   :  { %246 = vst [vmem:[#allocation2 + $0x30] sm:$0xff] %v228_v61 }
 0x1e2   :  { %250 = vst [vmem:[#allocation2 + $0x38] sm:$0xff] %v240_v62 }
 0x1e3   :  { %263 = dma.vmem_to_hbm [thread:$0]  %s256_s19, 1024, %s258_s1, [#allocation3], %s324_s21, %s324_s21, %s325_s22  }
 0x1e4   :  { %320 = dma.done.wait [#allocation3], 1024  }
 0x1e5   :  { %321 = vsyncadd [#allocation3], 4294966272 }
 0x1e6   :  { %268 = vsyncpa [#allocation3], 1 }

</bundles_post_ra>
